<compile_context>
chip_gen: v7x
topology: tpu7x:2x2x1
jax: 0.10.0
libtpu: 0.0.40
codegen_flags: <defaults>
</compile_context>

<pallas_src>
import functools
import math

import jax
import jax.numpy as jnp
from jax import lax
from jax.experimental import pallas as pl
from jax.experimental.pallas import tpu as pltpu


def _pos_enc_kernel(x_ref, inv_freq_ref, col_off_ref, o_ref, *, rows_per_slab: int):
    """Adds sinusoidal PE to a (tile_r, width) tile, width = rows_per_slab * d_model.

    Lane l of slab-row sr maps to original (row = sr*rows_per_slab + l // d_model,
    col = l % d_model).  All per-column work (inv_freq, phase, row-in-slab offset)
    is precomputed in the wrapper; the per-element path is mul + add + sin + add.
    """
    tile_r = x_ref.shape[0]

    # per-row base position (global), (tile_r, 1)
    slab_base = pl.program_id(0) * tile_r
    sub = lax.broadcasted_iota(jnp.int32, (tile_r, 1), 0)
    base_pos = ((slab_base + sub) * rows_per_slab).astype(jnp.float32)

    # angle = pos * inv_freq + (row_in_slab * inv_freq + phase); cos folded into phase
    angle = base_pos * inv_freq_ref[...] + col_off_ref[...]      # (tile_r, width) f32
    pe = jnp.sin(angle)                                          # 1 EUP op / element

    # add in the output dtype (bf16 add on v6e/v7x; f32 path unchanged for f32 inputs)
    o_ref[...] = x_ref[...] + pe.astype(o_ref.dtype)


def positional_encoding(x: jax.Array, max_seq_len: int = 512) -> jax.Array:
    """Pallas equivalent of PositionalEncoding.forward: x + pe[:x.shape[0]].

    x: (seq_len, embedding_size). seq_len <= max_seq_len, embedding_size even.
    """
    seq_len, d_model = x.shape
    assert seq_len <= max_seq_len, "seq_len exceeds max_seq_len"
    assert d_model % 2 == 0, "embedding_size must be even (sin/cos interleave)"

    # ---- lane packing: pack rows so the last dim is a multiple of 128 (lane-dense
    # stores).  width = lcm(d_model, 128); fall back to no packing for tiny seq_len.
    if d_model % 128 == 0:
        rows_per_slab = 1
    else:
        lcm = d_model * 128 // math.gcd(d_model, 128)
        rows_per_slab = lcm // d_model
        if rows_per_slab > max(1, seq_len):
            rows_per_slab = 1

    n_rows = pl.cdiv(seq_len, rows_per_slab)
    padded_rows = n_rows * rows_per_slab
    width = d_model * rows_per_slab

    x_p = x
    if padded_rows != seq_len:
        x_p = jnp.pad(x, ((0, padded_rows - seq_len), (0, 0)))
    x2 = x_p.reshape(n_rows, width) if rows_per_slab > 1 else x_p

    # ---- per-column constants, computed once on host-side JAX (tiny (1, width) arrays)
    lane = jnp.arange(width, dtype=jnp.int32)
    col = lane % d_model
    two_i = ((col // 2) * 2).astype(jnp.float32)
    inv_freq = jnp.exp(two_i * (-math.log(10000.0) / float(d_model)))
    phase = jnp.where(col % 2 == 0, 0.0, math.pi * 0.5).astype(jnp.float32)
    row_in_slab = (lane // d_model).astype(jnp.float32)
    col_off = row_in_slab * inv_freq + phase
    inv_freq = inv_freq.reshape(1, width)
    col_off = col_off.reshape(1, width)

    # ---- row tile: ~6 MiB per buffer, multiple of the dtype's sublane packing;
    # cap so the grid has >= 2 steps when possible (v7x megacore sharding).
    itemsize = x.dtype.itemsize
    sub_mult = {4: 8, 2: 16, 1: 32}.get(itemsize, 8)
    bytes_per_row = width * itemsize
    budget_rows = (6 << 20) // max(bytes_per_row, 1)
    budget_rows = max(sub_mult, (budget_rows // sub_mult) * sub_mult)
    if n_rows >= 2 * sub_mult:
        half = -(-((n_rows + 1) // 2) // sub_mult) * sub_mult   # ceil(n/2) -> sub mult
        budget_rows = min(budget_rows, half)

    tile_r = min(n_rows, budget_rows)
    if tile_r >= sub_mult:
        tile_r = (tile_r // sub_mult) * sub_mult     # partial last tile is masked
    else:
        tile_r = n_rows                              # tiny input: single full block
    grid = (pl.cdiv(n_rows, tile_r),)

    kernel = functools.partial(_pos_enc_kernel, rows_per_slab=rows_per_slab)

    out2 = pl.pallas_call(
        kernel,
        out_shape=jax.ShapeDtypeStruct((n_rows, width), x.dtype),
        grid_spec=pltpu.PrefetchScalarGridSpec(
            num_scalar_prefetch=0,
            grid=grid,
            in_specs=[
                pl.BlockSpec((tile_r, width), lambda i: (i, 0)),
                pl.BlockSpec((1, width), lambda i: (0, 0)),   # fetched once (const idx)
                pl.BlockSpec((1, width), lambda i: (0, 0)),
            ],
            out_specs=pl.BlockSpec((tile_r, width), lambda i: (i, 0)),
        ),
        compiler_params=pltpu.CompilerParams(
            dimension_semantics=("parallel",),
            vmem_limit_bytes=32 * 1024 * 1024,
        ),
        input_output_aliases={0: 0},    # elementwise add-in-place; frees one HBM buffer
    )(x2, inv_freq, col_off)

    out = out2.reshape(padded_rows, d_model) if rows_per_slab > 1 else out2
    return out[:seq_len] if padded_rows != seq_len else out


def _reference(x: jax.Array) -> jax.Array:
    """Pure-JAX reference mirroring the PyTorch buffer construction."""
    seq_len, d_model = x.shape
    position = jnp.arange(seq_len, dtype=jnp.float32)[:, None]
    div_term = jnp.exp(
        jnp.arange(0, d_model, 2, dtype=jnp.float32)
        * (-jnp.log(10000.0) / d_model)
    )
    pe = jnp.zeros((seq_len, d_model), dtype=jnp.float32)
    pe = pe.at[:, 0::2].set(jnp.sin(position * div_term))
    pe = pe.at[:, 1::2].set(jnp.cos(position * div_term))
    return x + pe


if __name__ == "__main__":
    key = jax.random.PRNGKey(0)

    # small shape consistent with the module's (seq_len, embedding_size) input
    seq_len, d_model = 8, 32
    x = jax.random.normal(key, (seq_len, d_model), dtype=jnp.float32)
    out = jax.block_until_ready(positional_encoding(x, max_seq_len=512))
    ref = _reference(x)
    assert out.shape == ref.shape
    assert jnp.allclose(out, ref, atol=1e-5, rtol=1e-5), "mismatch vs reference (8,32)"

    # exercises lcm lane-packing + row padding path (d_model not a divisor of 128)
    x2 = jax.random.normal(jax.random.PRNGKey(1), (10, 96), dtype=jnp.float32)
    out2 = jax.block_until_ready(positional_encoding(x2, max_seq_len=512))
    assert jnp.allclose(out2, _reference(x2), atol=1e-5, rtol=1e-5), "mismatch (10,96)"

    print("KERNEL_OK")
</pallas_src>

<mosaic_0001>
module attributes {stable_mosaic.version = 11 : i64} {
  func.func @_pos_enc_kernel(%arg0: i32, %arg1: memref<2x128xf32, #tpu.memory_space<vmem>>, %arg2: memref<1x128xf32, #tpu.memory_space<vmem>>, %arg3: memref<1x128xf32, #tpu.memory_space<vmem>>, %arg4: memref<2x128xf32, #tpu.memory_space<vmem>>) attributes {dimension_semantics = [#tpu.dimension_semantics<parallel>], iteration_bounds = array<i64: 1>, scalar_prefetch = 0 : i64, scratch_operands = 0 : i64, tpu.core_type = #tpu.core_type<tc>, window_params = [{transform_indices = @transform_0, window_bounds = array<i64: 2, 128>}, {pipeline_mode = #tpu.pipeline_mode<synchronous>, transform_indices = @transform_1, window_bounds = array<i64: 1, 128>}, {pipeline_mode = #tpu.pipeline_mode<synchronous>, transform_indices = @transform_2, window_bounds = array<i64: 1, 128>}, {transform_indices = @transform_3, window_bounds = array<i64: 2, 128>}]} {
    %c2_i32 = arith.constant 2 : i32
    %0 = arith.muli %arg0, %c2_i32 : i32
    %1 = tpu.iota {dimensions = array<i32: 0>} : vector<2x1xi32>
    %2 = vector.broadcast %0 : i32 to vector<2x1xi32>
    %3 = arith.addi %2, %1 : vector<2x1xi32>
    %c4_i32 = arith.constant 4 : i32
    %4 = vector.broadcast %c4_i32 : i32 to vector<2x1xi32>
    %5 = arith.muli %3, %4 : vector<2x1xi32>
    %6 = arith.sitofp %5 : vector<2x1xi32> to vector<2x1xf32>
    %c0 = arith.constant 0 : index
    %c0_0 = arith.constant 0 : index
    %7 = vector.load %arg2[%c0, %c0_0] : memref<1x128xf32, #tpu.memory_space<vmem>>, vector<1x128xf32>
    %8 = vector.broadcast %6 : vector<2x1xf32> to vector<2x128xf32>
    %9 = vector.broadcast %7 : vector<1x128xf32> to vector<2x128xf32>
    %10 = arith.mulf %8, %9 : vector<2x128xf32>
    %c0_1 = arith.constant 0 : index
    %c0_2 = arith.constant 0 : index
    %11 = vector.load %arg3[%c0_1, %c0_2] : memref<1x128xf32, #tpu.memory_space<vmem>>, vector<1x128xf32>
    %12 = vector.broadcast %11 : vector<1x128xf32> to vector<2x128xf32>
    %13 = arith.addf %10, %12 : vector<2x128xf32>
    %14 = math.sin %13 : vector<2x128xf32>
    %c0_3 = arith.constant 0 : index
    %c0_4 = arith.constant 0 : index
    %15 = vector.load %arg1[%c0_3, %c0_4] : memref<2x128xf32, #tpu.memory_space<vmem>>, vector<2x128xf32>
    %16 = arith.addf %15, %14 : vector<2x128xf32>
    %c0_5 = arith.constant 0 : index
    %c0_6 = arith.constant 0 : index
    %17 = vector.load %arg4[%c0_5, %c0_6] : memref<2x128xf32, #tpu.memory_space<vmem>>, vector<2x128xf32>
    tpu.vector_store %arg4[%c0_5, %c0_6], %16 {strides = array<i32>} : memref<2x128xf32, #tpu.memory_space<vmem>>, vector<2x128xf32>,
    return
  }
  func.func @transform_0(%arg0: i32) -> (i32, i32) {
    %c0_i32 = arith.constant 0 : i32
    %c0_i32_0 = arith.constant 0 : i32
    return %arg0, %c0_i32 : i32, i32
  }
  func.func @transform_1(%arg0: i32) -> (i32, i32) {
    %c0_i32 = arith.constant 0 : i32
    %c0_i32_0 = arith.constant 0 : i32
    %c0_i32_1 = arith.constant 0 : i32
    return %c0_i32, %c0_i32_0 : i32, i32
  }
  func.func @transform_2(%arg0: i32) -> (i32, i32) {
    %c0_i32 = arith.constant 0 : i32
    %c0_i32_0 = arith.constant 0 : i32
    %c0_i32_1 = arith.constant 0 : i32
    return %c0_i32, %c0_i32_0 : i32, i32
  }
  func.func @transform_3(%arg0: i32) -> (i32, i32) {
    %c0_i32 = arith.constant 0 : i32
    %c0_i32_0 = arith.constant 0 : i32
    return %arg0, %c0_i32 : i32, i32
  }
}

</mosaic_0001>

<bundles_post_ra>
// kernel: tpu_custom_call.1
= control target key start
LH: loop header
LB: loop body
LE: loop exit
PB: predicated region body
PF: predicated region fallthrough
CT: control target
= control target key end

     0   :  { %8 = vsyncpa [#allocation3], 0  ;;  %s321_s0 = inlined_call_operand.hbm [shape: f32[2,128], index: 0, kind: input, shape index: {}, may-alias: {0,3}]   ;;  %s322_s1 = inlined_call_operand.vmem [shape: f32[1,128], index: 1, kind: input, shape index: {}]   ;;  %s323_s2 = inlined_call_operand.vmem [shape: f32[1,128], index: 2, kind: input, shape index: {}]   ;;  %s324_s3 = inlined_call_operand.hbm [shape: f32[2,128], index: 3, kind: output, shape index: {}, may-alias: {0,3}]  }
   0x1   :  { %9 = vsyncpa [#allocation4], 0  ;;  %s242_s12 = smov [#allocation2]   ;;  %s194_s16 = scalar_lea.hbm %s321_s0, 32 }
   0x2   :  { %s16_s13 = sshll.u32 %s242_s12, 4  ;;  %p195_p0 = scmp.ne.s32.totalorder %s321_s0, %s194_s16  ;;  %s17_s13 = int_to_ptr.vmem [resolvable:$true] %s16_s13 }
   0x3   :  { %p198_p1 = scmp.lt.u32.totalorder %s194_s16, %s321_s0 }
   0x5   :  { %p200_p2 = pnand %p198_p1, %p195_p0 }
   0x7   :  { %203 = shalt.err (!%p200_p2)
}
   0x8   :  { %s204_s21 = scalar_lea.vmem %s17_s13, 32  ;;  %p209_p4 = scmp.lt.s32.totalorder %s17_s13, %s17_s13 }
   0x9   :  { %p205_p3 = scmp.ne.s32.totalorder %s17_s13, %s204_s21  ;;  %p210_p5 = scmp.lt.s32.totalorder %s204_s21, %s204_s21 }
   0xb   :  { %p211_p6 = por %p210_p5, %p209_p4 }
   0xd   :  { %p212_p7 = pnand %p211_p6, %p205_p3 }
   0xf   :  { %215 = shalt.err (!%p212_p7)
}
  0x10   :  { %19 = dma.hbm_to_vmem [thread:$0]  %s321_s0, 32, %s17_s13, [#allocation3]  }
  0x11   :  { %238 = dma.done.wait [#allocation3], 32  }
  0x12   :  { %239 = vsyncadd [#allocation3], 4294967264  ;;  %v28_v0 = vlaneseq  ;;  %v172_v4 = vld [vmem:[%s322_s1] ss:$0 sm:$0xff]  ;;  %v243_v19 = vmov 683565275  }
  0x13   :  { %v173_v5 = vld [vmem:[%s323_s2] ss:$0 sm:$0xff]  ;;  %v244_v21 = vmov 2475754826   ;;  %v245_v23 = vmov 2131351028  }
  0x14   :  { %v29_v1 = vshrl.u32 %v28_v0, 7  ;;  %v246_v25 = vmov 2102212464   ;;  %v247_v27 = vmov 920167782   ;;  %s249_s0 = smov [#allocation5]  }
  0x15   :  { %v248_v34 = vmov 1326507024   ;;  %s163_s1 = sshll.u32 %s249_s0, 4  ;;  %s164_s1 = int_to_ptr.vmem [resolvable:$true] %s163_s1 }
  0x16   :  { %v32_v2 = vmul.u32 4, %v29_v1  ;;  %s216_s2 = scalar_lea.vmem %s164_s1, 32  ;;  %p221_p9 = scmp.lt.s32.totalorder %s164_s1, %s164_s1 }
  0x17   :  { %p217_p8 = scmp.ne.s32.totalorder %s164_s1, %s216_s2  ;;  %p222_p10 = scmp.lt.s32.totalorder %s216_s2, %s216_s2 }
  0x18   :  { %v33_v3 = vcvt.s32.f32 %v32_v2 }
  0x19   :  { %p223_p11 = por %p222_p10, %p221_p9 }
  0x1a   :  { %v41_v6 = vmul.f32 %v172_v4, %v33_v3 }
  0x1b   :  { %p224_p12 = pnand %p223_p11, %p217_p8 }
  0x1c   :  { %v288_v7 = vadd.f32 %v173_v5, %v41_v6 }
  0x1e   :  { %v53_v8 = vand.u32 2139095040, %v288_v7  ;;  %v50_v10 = vand.u32 2147483647, %v288_v7  ;;  %vm52_vm7 = vcmp.lt.s32.totalorder %v288_v7, 0  ;;  %vm142_vm12 = vweird.f32 %v288_v7 }
  0x20   :  { %v54_v9 = vshrl.u32 %v53_v8, 23  ;;  %v57_v13 = vand.u32 8388607, %v50_v10  ;;  %vm51_vm8 = vcmp.le.f32.partialorder %v50_v10, 0.7853982 }
  0x22   :  { %v174_v11 = vadd.s32 4294967169, %v54_v9  ;;  %v58_v16 = vor.u32 8388608, %v57_v13 }
  0x24   :  { %v60_v12 = vadd.s32 1, %v174_v11  ;;  %v98_v36 = vshll.u32 %v58_v16, 8 }
  0x26   :  { %vm61_vm0 = vcmp.gt.s32.totalorder %v60_v12, 0 }
  0x27   :  { %v62_v14 = vsel %vm61_vm0, %v60_v12, 0 }
  0x28   :  { %v64_v15 = vand.u32 31, %v62_v14  ;;  %v63_v17 = vshrl.u32 %v62_v14, 5 }
  0x2a   :  { %v65_v18 = vsub.s32 32, %v64_v15  ;;  %v67_v20 = vshll.u32 %v243_v19, %v64_v15  ;;  %v70_v22 = vshll.u32 %v244_v21, %v64_v15  ;;  %v73_v24 = vshll.u32 %v245_v23, %v64_v15 }
  0x2b   :  { %v76_v26 = vshll.u32 %v246_v25, %v64_v15  ;;  %v79_v28 = vshll.u32 %v247_v27, %v64_v15  ;;  %vm82_vm1 = vcmp.lt.s32.totalorder %v63_v17, 1  ;;  %vm85_vm2 = vcmp.lt.s32.totalorder %v63_v17, 4 }
  0x2c   :  { %v66_v29 = vshrl.u32 %v243_v19, %v65_v18  ;;  %v68_v30 = vshrl.u32 %v244_v21, %v65_v18  ;;  %v71_v31 = vshrl.u32 %v245_v23, %v65_v18  ;;  %v74_v32 = vshrl.u32 %v246_v25, %v65_v18 }
  0x2d   :  { %v77_v33 = vshrl.u32 %v247_v27, %v65_v18  ;;  %v80_v35 = vshrl.u32 %v248_v34, %v65_v18  ;;  %vm83_vm3 = vcmp.lt.s32.totalorder %v63_v17, 2  ;;  %vm84_vm4 = vcmp.lt.s32.totalorder %v63_v17, 3  ;;  %v154_v34 = vld [vmem:[#allocation2] sm:$0x3] }
  0x2e   :  { %v69_v37 = vor.u32 %v68_v30, %v67_v20  ;;  %v72_v38 = vor.u32 %v71_v31, %v70_v22  ;;  %v75_v39 = vor.u32 %v74_v32, %v73_v24 }
  0x2f   :  { %v78_v40 = vor.u32 %v77_v33, %v76_v26  ;;  %v81_v41 = vor.u32 %v80_v35, %v79_v28 }
  0x30   :  { %v86_v42 = vsel %vm82_vm1, %v66_v29, %v69_v37  ;;  %v87_v43 = vsel %vm85_vm2, %v75_v39, 2102212464  ;;  %v90_v44 = vsel %vm82_vm1, %v69_v37, %v72_v38  ;;  %v94_v45 = vsel %vm82_vm1, %v72_v38, %v75_v39 }
  0x31   :  { %v88_v46 = vsel %vm84_vm4, %v72_v38, %v87_v43  ;;  %v91_v47 = vsel %vm85_vm2, %v78_v40, 920167782  ;;  %v95_v48 = vsel %vm85_vm2, %v81_v41, 1326507024 }
  0x32   :  { %v92_v49 = vsel %vm84_vm4, %v75_v39, %v91_v47  ;;  %v96_v50 = vsel %vm84_vm4, %v78_v40, %v95_v48  ;;  %v89_v51 = vsel %vm83_vm3, %v86_v42, %v88_v46 }
  0x33   :  { %v93_v52 = vsel %vm83_vm3, %v90_v44, %v92_v49  ;;  %v97_v53 = vsel %vm83_vm3, %v94_v45, %v96_v50  ;;  %v105_v58 = vmul.u32 %v98_v36, %v89_v51 }
  0x34   :  { %v294_v54 = vmul.u32.u64.low %v98_v36, %v97_v53  ;;  %v295_v55 = vmul.u32.u64.high %v98_v36, %v97_v53, %v294_v54  ;;  %v297_v56 = vmul.u32.u64.low %v98_v36, %v93_v52  ;;  %v298_v57 = vmul.u32.u64.high %v98_v36, %v93_v52, %v297_v56 }
  0x36   :  { %vm107_vm5 = vc.u32 %v295_v55, %v297_v56  ;;  %v108_v59 = vadd.s32 1, %v298_v57  ;;  %v106_v6 = vadd.s32 %v297_v56, %v295_v55 }
  0x38   :  { %v109_v60 = vsel %vm107_vm5, %v108_v59, %v298_v57 }
  0x39   :  { %v110_v61 = vadd.s32 %v109_v60, %v105_v58 }
  0x3b   :  { %v111_v62 = vadd.s32 536870912, %v110_v61 }
  0x3d   :  { %v112_v63 = vshrl.u32 %v111_v62, 30 }
  0x3f   :  { %v113_v0 = vshll.u32 %v112_v63, 30  ;;  %v136_v20 = vsub.s32 4, %v112_v63 }
  0x41   :  { %v114_v1 = vsub.s32 %v110_v61, %v113_v0  ;;  %v137_v23 = vsel %vm52_vm7, %v136_v20, %v112_v63 }
  0x42   :  { %v139_v26 = vsel %vm51_vm8, 0, %v137_v23 }
  0x43   :  { %v116_v2 = vsub.s32 0, %v114_v1  ;;  %v143_v27 = vadd.s32 3, %v139_v26 }
  0x45   :  { %v175_v3 = vmin.u32 %v116_v2, %v114_v1  ;;  %v144_v28 = vand.u32 3, %v143_v27 }
  0x47   :  { %v118_v4 = vclz %v175_v3  ;;  %vm149_vm9 = vcmp.eq.s32.totalorder %v144_v28, 2  ;;  %vm146_vm10 = vcmp.eq.s32.totalorder %v144_v28, 0  ;;  %vm145_vm11 = vcmp.lt.s32.totalorder %v144_v28, 2 }
  0x49   :  { %v176_v5 = vadd.s32 4294967294, %v118_v4 }
  0x4b   :  { %vm177_vm6 = vcmp.lt.s32.totalorder %v176_v5, 0 }
  0x4c   :  { %v121_v8 = vsel %vm177_vm6, 0, %v176_v5 }
  0x4d   :  { %v122_v9 = vsub.s32 32, %v121_v8  ;;  %v123_v11 = vshll.u32 %v114_v1, %v121_v8  ;;  %v126_v12 = vsub.s32 4294967266, %v121_v8 }
  0x4f   :  { %v124_v13 = vshrl.u32 %v106_v6, %v122_v9  ;;  %v127_v14 = vadd.s32 127, %v126_v12 }
  0x51   :  { %v125_v15 = vor.u32 %v124_v13, %v123_v11  ;;  %v128_v16 = vshll.u32 %v127_v14, 23 }
  0x53   :  { %v129_v17 = vor.u32 4788187, %v128_v16  ;;  %v132_v18 = vcvt.s32.f32 %v125_v15 }
  0x55   :  { %v130_v19 = vand.u32 2147483647, %v129_v17 }
  0x57   :  { %v133_v21 = vmul.f32 %v132_v18, %v130_v19 }
  0x59   :  { %v134_v22 = vxor.u32 2147483648, %v133_v21 }
  0x5b   :  { %v135_v24 = vsel %vm52_vm7, %v134_v22, %v133_v21 }
  0x5c   :  { %v138_v25 = vsel %vm51_vm8, %v288_v7, %v135_v24 }
  0x5d   :  { %190 = vcosq.f32 %v138_v25 }
  0x5e   :  { %192 = vsinq.f32 %v138_v25 }
  0x67   :  { %v191_v29 = vpop.eup %190 }
  0x68   :  { %v193_v30 = vpop.eup %192  ;;  %v150_v31 = vxor.u32 2147483648, %v191_v29 }
  0x69   :  { %v147_v32 = vxor.u32 2147483648, %v193_v30 }
  0x6a   :  { %v151_v10 = vsel %vm149_vm9, %v150_v31, %v193_v30 }
  0x6b   :  { %v148_v33 = vsel %vm146_vm10, %v191_v29, %v147_v32 }
  0x6c   :  { %v152_v35 = vsel %vm145_vm11, %v148_v33, %v151_v10 }
  0x6d   :  { %v153_v36 = vsel %vm142_vm12, nan, %v152_v35 }
  0x6e   :  { %v155_v37 = vadd.f32 %v154_v34, %v153_v36 }
  0x70   :  { %156 = vst [vmem:[#allocation5] sm:$0x3] %v155_v37 }
  0x71   :  { %227 = shalt.err (!%p224_p12)
}
  0x72   :  { %s228_s30 = scalar_lea.hbm %s324_s3, 32 }
  0x73   :  { %p229_p13 = scmp.ne.s32.totalorder %s324_s3, %s228_s30  ;;  %p232_p0 = scmp.lt.u32.totalorder %s228_s30, %s324_s3 }
  0x75   :  { %p234_p1 = pnand %p232_p0, %p229_p13 }
  0x77   :  { %237 = shalt.err (!%p234_p1)
}
  0x78   :  { %166 = dma.vmem_to_hbm [thread:$0]  %s164_s1, 32, %s324_s3, [#allocation4]  }
  0x79   :  { %240 = dma.done.wait [#allocation4], 32  }
  0x7a   :  { %241 = vsyncadd [#allocation4], 4294967264 }
  0x7b   :  { %170 = vsyncpa [#allocation3], 1 }
  0x7c   :  { %171 = vsyncpa [#allocation4], 1 }

</bundles_post_ra>
